<compile_context>
chip_gen: v7x
topology: tpu7x:2x2x1
jax: 0.10.0
libtpu: 0.0.40
codegen_flags: <defaults>
</compile_context>

<pallas_src>
import jax
import jax.numpy as jnp
from jax.experimental import pallas as pl
from jax.experimental.pallas import tpu as pltpu


def _round_up(x, m):
    return ((x + m - 1) // m) * m


def _cdiv(a, b):
    return (a + b - 1) // b


def _vmem_budget():
    """Returns (vmem_limit_bytes, cap_m, cap_n, cap_k) for this TPU generation."""
    try:
        cap = int(pltpu.get_tpu_info().vmem_capacity_bytes)
    except Exception:
        cap = 64 * 1024 * 1024  # conservative default (v7x-sized VMEM)
    if cap >= 100 * 1024 * 1024:
        # v5e / v6e: 128 MiB physical VMEM -> bigger resident tiles.
        return 100 * 1024 * 1024, 512, 512, 2048
    # v7x: 64 MiB physical VMEM.
    return 44 * 1024 * 1024, 512, 512, 1024


def _single_block_kernel(x_ref, w_ref, b_ref, o_ref):
    # Whole problem fits one VMEM block: one MXU matmul + bias, no grid.
    o_ref[...] = (
        jnp.dot(x_ref[...], w_ref[...], preferred_element_type=jnp.float32)
        + b_ref[...].astype(jnp.float32)
    ).astype(o_ref.dtype)


def _tiled_linear_kernel(x_ref, w_ref, b_ref, o_ref):
    k = pl.program_id(2)

    @pl.when(k == 0)
    def _init():
        # Output block is resident across the K axis (same block index), so it
        # doubles as the f32 accumulator; fold the bias into its init.
        o_ref[...] = jnp.broadcast_to(
            b_ref[...].astype(jnp.float32), o_ref.shape
        )

    # bf16 x bf16 -> f32 MXU matmul, accumulated directly into the output.
    o_ref[...] += jnp.dot(
        x_ref[...], w_ref[...], preferred_element_type=jnp.float32
    )


def lin_net_forward(x, w, b):
    """Pallas implementation of LinNet.forward: y = x @ w + b.

    x: (B, insize) float32
    w: (insize, outsize) float32  (transpose of torch's fc1.weight)
    b: (1, outsize) float32
    returns: (B, outsize) float32
    """
    B, K = x.shape
    N = w.shape[1]
    out_dtype = jnp.float32

    # bf16 inputs, f32 accumulation (accumulator / bias / output stay f32).
    xb = x.astype(jnp.bfloat16)
    wb = w.astype(jnp.bfloat16)
    bf = b.astype(jnp.float32)

    vmem_limit, cap_m, cap_n, cap_k = _vmem_budget()

    flops = 2 * B * N * K
    bytes_accessed = xb.size * 2 + wb.size * 2 + bf.size * 4 + B * N * 4
    cost = pl.CostEstimate(
        flops=flops, transcendentals=0, bytes_accessed=bytes_accessed
    )

    # ---------- small-problem fast path: single block, no grid machinery ----
    if B <= cap_m and N <= cap_n and K <= cap_k:
        return pl.pallas_call(
            _single_block_kernel,
            out_shape=jax.ShapeDtypeStruct((B, N), out_dtype),
            cost_estimate=cost,
        )(xb, wb, bf)

    # ---------- tiled (M, N, K) path ----------------------------------------
    # If a dimension fits entirely in one tile, use the full dimension as the
    # tile (legal block shape, no padding); otherwise use the aligned cap and
    # let Pallas handle partial edge blocks along M / N.
    tm = B if B <= cap_m else cap_m          # cap_m multiple of 16 (bf16 rows)
    tn = N if N <= cap_n else cap_n          # cap_n multiple of 128 (lanes)
    tk = K if K <= cap_k else cap_k          # cap_k multiple of 256

    grid_m = _cdiv(B, tm)
    grid_n = _cdiv(N, tn)

    # v7x has 2 TensorCores: make sure the 'parallel' grid has >= 2 blocks
    # when possible so both cores get work.
    if grid_m == 1 and grid_n == 1 and N >= 256:
        tn = _round_up(_cdiv(N, 2), 128)
        grid_n = _cdiv(N, tn)

    # Only the K (reduction) axis ever needs zero padding for correctness;
    # garbage in partial M/N edge blocks only affects discarded rows/cols.
    Kp = _round_up(K, tk)
    if Kp != K:
        xb = jnp.pad(xb, ((0, 0), (0, Kp - K)))
        wb = jnp.pad(wb, ((0, Kp - K), (0, 0)))
    grid_k = Kp // tk

    # TODO(synk): when tm * Kp * 2B (double-buffered) fits VMEM, keep the full
    # K strip of x resident per M block ((tm, Kp) BlockSpec + pl.ds inside the
    # kernel) to avoid re-streaming x once per N tile.
    out = pl.pallas_call(
        _tiled_linear_kernel,
        out_shape=jax.ShapeDtypeStruct((B, N), out_dtype),
        grid=(grid_m, grid_n, grid_k),
        in_specs=[
            pl.BlockSpec((tm, tk), lambda i, j, k: (i, k)),
            pl.BlockSpec((tk, tn), lambda i, j, k: (k, j)),
            pl.BlockSpec((1, tn), lambda i, j, k: (0, j)),
        ],
        out_specs=pl.BlockSpec((tm, tn), lambda i, j, k: (i, j)),
        compiler_params=pltpu.CompilerParams(
            dimension_semantics=("parallel", "parallel", "arbitrary"),
            vmem_limit_bytes=vmem_limit,
        ),
        cost_estimate=cost,
    )(xb, wb, bf)
    return out


if __name__ == "__main__":
    # Small shapes implied by the module: a plain Linear(insize -> outsize).
    batch, insize, outsize = 8, 32, 16

    key = jax.random.PRNGKey(0)
    kx, kw, kb = jax.random.split(key, 3)

    # Deterministic init mimicking nn.Linear's U(-1/sqrt(in), 1/sqrt(in)).
    bound = 1.0 / (insize ** 0.5)
    # torch stores weight as (outsize, insize); we keep the transposed layout.
    w_torch_layout = jax.random.uniform(
        kw, (outsize, insize), jnp.float32, minval=-bound, maxval=bound
    )
    w = jnp.transpose(w_torch_layout)                      # (insize, outsize)
    b = jax.random.uniform(
        kb, (1, outsize), jnp.float32, minval=-bound, maxval=bound
    )
    x = jax.random.normal(kx, (batch, insize), jnp.float32)

    y = lin_net_forward(x, w, b)
    jax.block_until_ready(y)
    assert y.shape == (batch, outsize)

    # Reference with the same bf16 input cast (accumulation stays f32).
    xb = x.astype(jnp.bfloat16).astype(jnp.float32)
    wb = w.astype(jnp.bfloat16).astype(jnp.float32)
    y_ref_bf16 = xb @ wb + b
    y_ref_f32 = x @ w + b
    assert jnp.allclose(y, y_ref_bf16, atol=1e-4, rtol=1e-4)
    assert jnp.allclose(y, y_ref_f32, atol=5e-2, rtol=5e-2)

    # Larger, non-aligned shapes to exercise the tiled (M, N, K) path,
    # partial edge blocks and the K-only padding.
    B2, K2, N2 = 1000, 700, 900
    k1, k2, k3 = jax.random.split(jax.random.PRNGKey(1), 3)
    x2 = jax.random.normal(k1, (B2, K2), jnp.float32)
    w2 = jax.random.normal(k2, (K2, N2), jnp.float32) / (K2 ** 0.5)
    b2 = jax.random.normal(k3, (1, N2), jnp.float32)

    y2 = lin_net_forward(x2, w2, b2)
    jax.block_until_ready(y2)
    assert y2.shape == (B2, N2)

    ref2 = (
        x2.astype(jnp.bfloat16).astype(jnp.float32)
        @ w2.astype(jnp.bfloat16).astype(jnp.float32)
        + b2
    )
    assert jnp.allclose(y2, ref2, atol=2e-3, rtol=2e-3)

    print("KERNEL_OK")
</pallas_src>

<mosaic_0001>
module attributes {stable_mosaic.version = 11 : i64} {
  func.func @_single_block_kernel(%arg0: memref<8x32xbf16, #tpu.memory_space<vmem>>, %arg1: memref<32x16xbf16, #tpu.memory_space<vmem>>, %arg2: memref<1x16xf32, #tpu.memory_space<vmem>>, %arg3: memref<8x16xf32, #tpu.memory_space<vmem>>) attributes {dimension_semantics = [], scalar_prefetch = 0 : i64, scratch_operands = 0 : i64, tpu.core_type = #tpu.core_type<tc>} {
    %c0 = arith.constant 0 : index
    %c0_0 = arith.constant 0 : index
    %0 = vector.load %arg0[%c0, %c0_0] : memref<8x32xbf16, #tpu.memory_space<vmem>>, vector<8x32xbf16>
    %c0_1 = arith.constant 0 : index
    %c0_2 = arith.constant 0 : index
    %1 = vector.load %arg1[%c0_1, %c0_2] : memref<32x16xbf16, #tpu.memory_space<vmem>>, vector<32x16xbf16>
    %cst = arith.constant dense<0.000000e+00> : vector<8x16xf32>
    %2 = tpu.matmul %0, %1, %cst {dimension_numbers = #tpu.dot_dimension_numbers<[1], [0], [0], [1], [0, 0, 1, 1], [], []>} : vector<8x32xbf16>, vector<32x16xbf16>, vector<8x16xf32> -> vector<8x16xf32>
    %c0_3 = arith.constant 0 : index
    %c0_4 = arith.constant 0 : index
    %3 = vector.load %arg2[%c0_3, %c0_4] : memref<1x16xf32, #tpu.memory_space<vmem>>, vector<1x16xf32>
    %4 = vector.broadcast %3 : vector<1x16xf32> to vector<8x16xf32>
    %5 = arith.addf %2, %4 : vector<8x16xf32>
    %c0_5 = arith.constant 0 : index
    %c0_6 = arith.constant 0 : index
    %6 = vector.load %arg3[%c0_5, %c0_6] : memref<8x16xf32, #tpu.memory_space<vmem>>, vector<8x16xf32>
    tpu.vector_store %arg3[%c0_5, %c0_6], %5 {strides = array<i32>} : memref<8x16xf32, #tpu.memory_space<vmem>>, vector<8x16xf32>,
    return
  }
}

</mosaic_0001>

<bundles_post_ra>
// kernel: tpu_custom_call.1
= control target key start
LH: loop header
LB: loop body
LE: loop exit
PB: predicated region body
PF: predicated region fallthrough
CT: control target
= control target key end

     0   :  { %v144_v1 = vmov 0.0   ;;  %vm145_vm0 = vmmov 0   ;;  %s191_s0 = inlined_call_operand.vmem [shape: bf16[8,32], index: 0, kind: input, shape index: {}]   ;;  %s192_s1 = inlined_call_operand.vmem [shape: bf16[32,16], index: 1, kind: input, shape index: {}]   ;;  %s193_s2 = inlined_call_operand.vmem [shape: f32[1,16], index: 2, kind: input, shape index: {}]   ;;  %s194_s3 = inlined_call_operand.hbm [shape: f32[8,16], index: 3, kind: output, shape index: {}]  }
   0x1   :  { %v118_v0 = vld [vmem:[%s192_s1] sm:$0xff]   ;;  %107 = vmatprep.subr.bf16.mxu0 %v144_v1  ;;  %v119_v2 = vld [vmem:[%s192_s1 + $0x8] sm:$0xff]   ;;  %111 = vmatprep.mubr.msk.bf16.mxu0 %vm145_vm0, %v144_v1 }
   0x2   :  { %108 = vmatpush3.bf16.msra.mxu0 %v118_v0 }
   0x3   :  { %109 = vmatprep.subr.bf16.mxu0 %v144_v1 }
   0x4   :  { %8 = vsyncpa [#allocation3], 0  ;;  %v16_v3 = vld [vmem:[%s191_s0] sm:$0xf]  ;;  %vm40_vm1 = vcmask 261120   ;;  %s146_s20 = smov [#allocation2]  }
   0x5   :  { %v100_v4 = vld [vmem:[%s193_s2] ss:$0 sm:$0xff]  ;;  %s92_s21 = sshll.u32 %s146_s20, 4  ;;  %vm84_vm2 = vcmask 130048   ;;  %s93_s21 = int_to_ptr.vmem [resolvable:$true] %s92_s21 }
   0x6   :  { %110 = vmatpush3.bf16.msra.mxu0 %v119_v2  ;;  %s120_s1 = scalar_lea.vmem %s93_s21, 128  ;;  %p125_p1 = scmp.lt.s32.totalorder %s93_s21, %s93_s21 }
   0x7   :  { %p121_p0 = scmp.ne.s32.totalorder %s93_s21, %s120_s1  ;;  %p126_p2 = scmp.lt.s32.totalorder %s120_s1, %s120_s1 }
   0x9   :  { %112 = vmatmul.mubr.msk.bf16.vlgmr.msra.gmra.mrb[0].mxu0 %vm40_vm1, %v16_v3  ;;  %p127_p3 = por %p126_p2, %p125_p1 }
   0xb   :  { %p128_p4 = pnand %p127_p3, %p121_p0 }
  0xdc   :  { %v78_v5 = vpop.f32.mrb[0].mxu0 }
  0xdd   :  { %v79_v6 = vadd.f32 %v100_v4, %v78_v5  ;;  %v113_v7 = vpop.f32.mrb[1].mxu0 }
  0xde   :  { %v81_v8 = vpop.f32.mrb[2].mxu0 }
  0xdf   :  { %v114_v9 = vpop.f32.mrb[3].mxu0  ;;  %85 = vst.msk [vmem:[#allocation2] sm:$0xff] %vm84_vm2, %v79_v6 }
  0xe0   :  { %131 = shalt.err (!%p128_p4)
}
  0xe1   :  { %s132_s2 = scalar_lea.hbm %s194_s3, 128 }
  0xe2   :  { %p133_p5 = scmp.ne.s32.totalorder %s194_s3, %s132_s2  ;;  %p136_p6 = scmp.lt.u32.totalorder %s132_s2, %s194_s3 }
  0xe4   :  { %p138_p7 = pnand %p136_p6, %p133_p5 }
  0xe6   :  { %141 = shalt.err (!%p138_p7)
}
  0xe7   :  { %95 = dma.vmem_to_hbm [thread:$0]  %s93_s21, 128, %s194_s3, [#allocation3]  }
  0xe8   :  { %142 = dma.done.wait [#allocation3], 128  }
  0xe9   :  { %143 = vsyncadd [#allocation3], 4294967168 }
  0xea   :  { %99 = vsyncpa [#allocation3], 1 }

</bundles_post_ra>
